<compile_context>
chip_gen: v7x
topology: tpu7x:2x2x1
jax: 0.10.0
libtpu: 0.0.40
codegen_flags: <defaults>
</compile_context>

<pallas_src>
import functools

import jax
import jax.numpy as jnp
from jax import lax
from jax.experimental import pallas as pl
from jax.experimental.pallas import tpu as pltpu

_EPS = 1e-6  # torch.nn.functional.pairwise_distance default eps


def _contrastive_loss_kernel(o1_ref, o2_ref, label_ref, out_ref, acc_ref, *,
                             margin, batch, tile_rows, steps, padded):
    p = pl.program_id(0)          # partial-sum / megacore index ("parallel")
    i = pl.program_id(1)          # streaming step over the batch ("arbitrary")

    @pl.when(i == 0)
    def _init():
        acc_ref[...] = jnp.zeros_like(acc_ref)

    # Features arrive at native dtype; upcast per tile (halves HBM for bf16).
    o1 = o1_ref[...].astype(jnp.float32)                       # (TB, D)
    o2 = o2_ref[...].astype(jnp.float32)                       # (TB, D)
    diff = o1 - o2 + _EPS
    row_sq = jnp.sum(diff * diff, axis=-1, keepdims=True)      # (TB, 1) == d^2
    dist = jnp.sqrt(row_sq)                                    # d, hinge term only
    hinge = jnp.maximum(margin - dist, 0.0)
    hinge_sq = hinge * hinge                                   # (TB, 1)

    lbl = label_ref[...].astype(jnp.float32)                   # (1, TB) lane-dense
    w_pos = 1.0 - lbl
    w_neg = lbl

    if padded:  # compile-time: mask logical rows beyond the real batch.
        base = (p * steps + i) * tile_rows
        rid = base + lax.broadcasted_iota(jnp.int32, (tile_rows, 1), 0)
        cid = base + lax.broadcasted_iota(jnp.int32, (1, tile_rows), 1)
        # Keep these as jnp.where selects (NaN-safe for stale-VMEM rows).
        row_sq = jnp.where(rid < batch, row_sq, 0.0)
        hinge_sq = jnp.where(rid < batch, hinge_sq, 0.0)
        w_pos = jnp.where(cid < batch, w_pos, 0.0)
        w_neg = jnp.where(cid < batch, w_neg, 0.0)

    # Batch reduction as two (1,TB)@(TB,1) dots: the lane-dense label and the
    # sublane-laid per-row values meet in the contraction, so no relayout is
    # needed and the reduce runs on the otherwise-idle MXU.
    step_sum = (
        jnp.dot(w_pos, row_sq, precision=lax.Precision.HIGHEST,
                preferred_element_type=jnp.float32)
        + jnp.dot(w_neg, hinge_sq, precision=lax.Precision.HIGHEST,
                  preferred_element_type=jnp.float32))          # (1, 1)

    acc_ref[...] += step_sum        # broadcast add into (8,128): pure VPU, no SMEM

    @pl.when(i == pl.num_programs(1) - 1)
    def _finalize():
        out_ref[...] = acc_ref[...]


def contrastive_loss(output1, output2, label, margin=2.0, tile_rows=None):
    """Pallas TPU implementation of ContrastiveLoss.forward.

    output1, output2: (B, D) float (f32 / bf16 accepted at native width)
    label:            (B,), (B, 1) or (1, B) (0 = similar, 1 = dissimilar)
    returns:          () float32 scalar
    """
    output1 = jnp.asarray(output1)
    output2 = jnp.asarray(output2)
    if output2.dtype != output1.dtype:
        output2 = output2.astype(output1.dtype)
    B, D = output1.shape
    label = jnp.asarray(label).reshape(1, B)
    if not jnp.issubdtype(label.dtype, jnp.floating):
        label = label.astype(jnp.float32)

    # ---- per-generation VMEM / tile sizing ---------------------------------
    try:
        vmem_cap = int(getattr(pltpu.get_tpu_info(), "vmem_capacity_bytes",
                               64 << 20))
    except Exception:
        vmem_cap = 64 << 20                      # conservative (v7x-sized) fallback
    small_vmem = vmem_cap <= (80 << 20)          # v7x-like: 64 MiB VMEM, 2 TCs
    vmem_budget = max(vmem_cap - (16 << 20), 8 << 20)

    itemsize = jnp.dtype(output1.dtype).itemsize
    row_bytes = max(D * itemsize, 1)
    if tile_rows is None:
        per_input_target = (4 << 20) if small_vmem else (8 << 20)
        tile_rows = per_input_target // row_bytes
    tile_rows = int(tile_rows)
    if tile_rows < B:
        tile_rows = max(128, (tile_rows // 128) * 128)   # lane+sublane aligned
    if tile_rows >= B:
        tile_rows = B                                    # single full block

    def _vmem_estimate(rows, n_buf):
        feat = rows * row_bytes                          # one feature tile (native)
        lbl_buf = 8 * rows * 4                           # (1,TB) padded to 8 sublanes
        temps = 3 * rows * D * 4                         # f32 upcast / elementwise temps
        return 2 * n_buf * feat + 2 * lbl_buf + temps + (4 << 20)

    while tile_rows > 128 and _vmem_estimate(tile_rows, 2) > vmem_budget:
        tile_rows = max(128, ((tile_rows // 2) // 128) * 128)

    num_blocks = -(-B // tile_rows)
    num_partials = 2 if num_blocks >= 2 else 1   # split batch across v7x's 2 TCs
    steps = -(-num_blocks // num_partials)
    padded = (num_partials * steps * tile_rows) != B
    last_block = num_blocks - 1

    use_buf3 = (small_vmem and num_blocks >= 4
                and _vmem_estimate(tile_rows, 3) <= vmem_budget)
    n_buf = 3 if use_buf3 else 2
    vmem_bytes = int(min(max(_vmem_estimate(tile_rows, n_buf), 8 << 20),
                         vmem_budget))

    # Clamp redundant tail block indices into range; their logical rows are
    # >= B so the in-kernel mask zeros their contribution.
    feat_map = lambda p, i: (jnp.minimum(p * steps + i, last_block), 0)
    label_map = lambda p, i: (0, jnp.minimum(p * steps + i, last_block))
    feat_kwargs = {"pipeline_mode": pl.Buffered(3)} if use_buf3 else {}

    kernel = functools.partial(
        _contrastive_loss_kernel,
        margin=float(margin), batch=int(B),
        tile_rows=int(tile_rows), steps=int(steps), padded=bool(padded))

    out = pl.pallas_call(
        kernel,
        out_shape=jax.ShapeDtypeStruct((num_partials * 8, 128), jnp.float32),
        grid=(num_partials, steps),
        in_specs=[
            pl.BlockSpec((tile_rows, D), feat_map, **feat_kwargs),
            pl.BlockSpec((tile_rows, D), feat_map, **feat_kwargs),
            pl.BlockSpec((1, tile_rows), label_map),
        ],
        out_specs=pl.BlockSpec((8, 128), lambda p, i: (p, 0)),
        scratch_shapes=[pltpu.VMEM((8, 128), jnp.float32)],
        compiler_params=pltpu.CompilerParams(
            dimension_semantics=("parallel", "arbitrary"),
            vmem_limit_bytes=vmem_bytes),
    )(output1, output2, label)

    # Each (8,128) output block is filled with that partial's sum; pick one
    # element per block, combine, and take the mean.
    partials = out[::8, 0]
    return jnp.sum(partials) / B


def _reference(output1, output2, label, margin=2.0):
    # Pure-JAX reference mirroring the PyTorch code (label used elementwise).
    o1 = jnp.asarray(output1, jnp.float32)
    o2 = jnp.asarray(output2, jnp.float32)
    lbl = jnp.asarray(label, jnp.float32).reshape(-1, 1)
    diff = o1 - o2 + _EPS
    d = jnp.sqrt(jnp.sum(diff * diff, axis=-1, keepdims=True))
    hinge = jnp.maximum(margin - d, 0.0)
    return jnp.mean((1.0 - lbl) * d ** 2 + lbl * hinge ** 2)


if __name__ == "__main__":
    key = jax.random.PRNGKey(0)
    k1, k2, k3 = jax.random.split(key, 3)

    # 1) Small siamese-branch embeddings, as in the module's typical usage.
    B, D = 8, 32
    o1 = jax.random.normal(k1, (B, D), dtype=jnp.float32)
    o2 = jax.random.normal(k2, (B, D), dtype=jnp.float32)
    lbl = jax.random.bernoulli(k3, p=0.5, shape=(B, 1)).astype(jnp.float32)
    loss = jax.block_until_ready(contrastive_loss(o1, o2, lbl, margin=2.0))
    ref = _reference(o1, o2, lbl, margin=2.0)
    assert jnp.allclose(loss, ref, rtol=1e-5, atol=1e-6), (loss, ref)

    # 2) Tiled path: 5 row-blocks, 2 partials (megacore split), masked
    #    redundant tail block, f32.
    k4, k5, k6 = jax.random.split(jax.random.PRNGKey(0), 3)
    B2, D2 = 640, 128
    o1b = jax.random.normal(k4, (B2, D2), dtype=jnp.float32)
    o2b = jax.random.normal(k5, (B2, D2), dtype=jnp.float32)
    lblb = jax.random.bernoulli(k6, p=0.5, shape=(B2,)).astype(jnp.float32)
    loss2 = jax.block_until_ready(
        contrastive_loss(o1b, o2b, lblb, margin=2.0, tile_rows=128))
    ref2 = _reference(o1b, o2b, lblb, margin=2.0)
    assert jnp.allclose(loss2, ref2, rtol=1e-5, atol=1e-6), (loss2, ref2)

    # 3) Native bf16 path with a ragged final block (stale-row masking) and a
    #    clamped redundant block on the second partial.
    k7, k8, k9 = jax.random.split(jax.random.PRNGKey(1), 3)
    B3, D3 = 300, 256
    o1c = jax.random.normal(k7, (B3, D3), dtype=jnp.bfloat16)
    o2c = jax.random.normal(k8, (B3, D3), dtype=jnp.bfloat16)
    lblc = jax.random.bernoulli(k9, p=0.5, shape=(B3, 1)).astype(jnp.float32)
    loss3 = jax.block_until_ready(
        contrastive_loss(o1c, o2c, lblc, margin=2.0, tile_rows=128))
    ref3 = _reference(o1c, o2c, lblc, margin=2.0)
    assert jnp.allclose(loss3, ref3, rtol=1e-4, atol=1e-5), (loss3, ref3)

    print("KERNEL_OK")
</pallas_src>

<mosaic_0001>
module attributes {stable_mosaic.version = 11 : i64} {
  func.func @_contrastive_loss_kernel(%arg0: i32, %arg1: i32, %arg2: memref<8x32xf32, #tpu.memory_space<vmem>>, %arg3: memref<8x32xf32, #tpu.memory_space<vmem>>, %arg4: memref<1x8xf32, #tpu.memory_space<vmem>>, %arg5: memref<8x128xf32, #tpu.memory_space<vmem>>, %arg6: memref<8x128xf32, #tpu.memory_space<vmem>>) attributes {dimension_semantics = [#tpu.dimension_semantics<parallel>, #tpu.dimension_semantics<arbitrary>], iteration_bounds = array<i64: 1, 1>, scalar_prefetch = 0 : i64, scratch_operands = 1 : i64, tpu.core_type = #tpu.core_type<tc>, window_params = [{transform_indices = @transform_0, window_bounds = array<i64: 8, 32>}, {transform_indices = @transform_1, window_bounds = array<i64: 8, 32>}, {transform_indices = @transform_2, window_bounds = array<i64: 1, 8>}, {transform_indices = @transform_3, window_bounds = array<i64: 8, 128>}]} {
    %c0_i32 = arith.constant 0 : i32
    %0 = arith.cmpi eq, %arg1, %c0_i32 : i32
    %1 = arith.extui %0 : i1 to i32
    %c0_i32_0 = arith.constant 0 : i32
    %2 = arith.cmpi ne, %1, %c0_i32_0 : i32
    scf.if %2 {
      %cst_18 = arith.constant 0.000000e+00 : f32
      %30 = vector.broadcast %cst_18 : f32 to vector<8x128xf32>
      %c0_19 = arith.constant 0 : index
      %c0_20 = arith.constant 0 : index
      %31 = vector.load %arg6[%c0_19, %c0_20] : memref<8x128xf32, #tpu.memory_space<vmem>>, vector<8x128xf32>
      tpu.vector_store %arg6[%c0_19, %c0_20], %30 {strides = array<i32>} : memref<8x128xf32, #tpu.memory_space<vmem>>, vector<8x128xf32>,
    } else {
    }
    %c0 = arith.constant 0 : index
    %c0_1 = arith.constant 0 : index
    %3 = vector.load %arg2[%c0, %c0_1] : memref<8x32xf32, #tpu.memory_space<vmem>>, vector<8x32xf32>
    %c0_2 = arith.constant 0 : index
    %c0_3 = arith.constant 0 : index
    %4 = vector.load %arg3[%c0_2, %c0_3] : memref<8x32xf32, #tpu.memory_space<vmem>>, vector<8x32xf32>
    %5 = arith.subf %3, %4 : vector<8x32xf32>
    %cst = arith.constant 9.99999997E-7 : f32
    %6 = vector.broadcast %cst : f32 to vector<8x32xf32>
    %7 = arith.addf %5, %6 : vector<8x32xf32>
    %8 = arith.mulf %7, %7 : vector<8x32xf32>
    %cst_4 = arith.constant dense<0.000000e+00> : vector<8xf32>
    %9 = vector.multi_reduction <add>, %8, %cst_4 [1] : vector<8x32xf32> to vector<8xf32>
    %10 = vector.shape_cast %9 : vector<8xf32> to vector<8x1xf32>
    %11 = math.sqrt %10 : vector<8x1xf32>
    %cst_5 = arith.constant 2.000000e+00 : f32
    %12 = vector.broadcast %cst_5 : f32 to vector<8x1xf32>
    %13 = arith.subf %12, %11 : vector<8x1xf32>
    %cst_6 = arith.constant 0.000000e+00 : f32
    %14 = vector.broadcast %cst_6 : f32 to vector<8x1xf32>
    %15 = arith.maximumf %13, %14 : vector<8x1xf32>
    %16 = arith.mulf %15, %15 : vector<8x1xf32>
    %c0_7 = arith.constant 0 : index
    %c0_8 = arith.constant 0 : index
    %17 = vector.load %arg4[%c0_7, %c0_8] : memref<1x8xf32, #tpu.memory_space<vmem>>, vector<1x8xf32>
    %cst_9 = arith.constant 1.000000e+00 : f32
    %18 = vector.broadcast %cst_9 : f32 to vector<1x8xf32>
    %19 = arith.subf %18, %17 : vector<1x8xf32>
    %cst_10 = arith.constant dense<0.000000e+00> : vector<1x1xf32>
    %20 = tpu.matmul %19, %10, %cst_10 {dimension_numbers = #tpu.dot_dimension_numbers<[1], [0], [0], [1], [0, 0, 1, 1], [], []>, precision = #tpu.contract_precision<fp32>} : vector<1x8xf32>, vector<8x1xf32>, vector<1x1xf32> -> vector<1x1xf32>
    %cst_11 = arith.constant dense<0.000000e+00> : vector<1x1xf32>
    %21 = tpu.matmul %17, %16, %cst_11 {dimension_numbers = #tpu.dot_dimension_numbers<[1], [0], [0], [1], [0, 0, 1, 1], [], []>, precision = #tpu.contract_precision<fp32>} : vector<1x8xf32>, vector<8x1xf32>, vector<1x1xf32> -> vector<1x1xf32>
    %22 = arith.addf %20, %21 : vector<1x1xf32>
    %c0_12 = arith.constant 0 : index
    %c0_13 = arith.constant 0 : index
    %23 = vector.load %arg6[%c0_12, %c0_13] : memref<8x128xf32, #tpu.memory_space<vmem>>, vector<8x128xf32>
    %24 = vector.broadcast %22 : vector<1x1xf32> to vector<8x128xf32>
    %25 = arith.addf %23, %24 : vector<8x128xf32>
    %c0_14 = arith.constant 0 : index
    %c0_15 = arith.constant 0 : index
    %26 = vector.load %arg6[%c0_14, %c0_15] : memref<8x128xf32, #tpu.memory_space<vmem>>, vector<8x128xf32>
    tpu.vector_store %arg6[%c0_14, %c0_15], %25 {strides = array<i32>} : memref<8x128xf32, #tpu.memory_space<vmem>>, vector<8x128xf32>,
    %c0_i32_16 = arith.constant 0 : i32
    %27 = arith.cmpi eq, %arg1, %c0_i32_16 : i32
    %28 = arith.extui %27 : i1 to i32
    %c0_i32_17 = arith.constant 0 : i32
    %29 = arith.cmpi ne, %28, %c0_i32_17 : i32
    scf.if %29 {
      %c0_18 = arith.constant 0 : index
      %c0_19 = arith.constant 0 : index
      %30 = vector.load %arg6[%c0_18, %c0_19] : memref<8x128xf32, #tpu.memory_space<vmem>>, vector<8x128xf32>
      %c0_20 = arith.constant 0 : index
      %c0_21 = arith.constant 0 : index
      %31 = vector.load %arg5[%c0_20, %c0_21] : memref<8x128xf32, #tpu.memory_space<vmem>>, vector<8x128xf32>
      tpu.vector_store %arg5[%c0_20, %c0_21], %30 {strides = array<i32>} : memref<8x128xf32, #tpu.memory_space<vmem>>, vector<8x128xf32>,
    } else {
    }
    return
  }
  func.func @transform_0(%arg0: i32, %arg1: i32) -> (i32, i32) {
    %c1_i32 = arith.constant 1 : i32
    %0 = arith.muli %arg0, %c1_i32 : i32
    %1 = arith.addi %0, %arg1 : i32
    %c0_i32 = arith.constant 0 : i32
    %2 = arith.minsi %1, %c0_i32 : i32
    %c0_i32_0 = arith.constant 0 : i32
    %c0_i32_1 = arith.constant 0 : i32
    return %2, %c0_i32_0 : i32, i32
  }
  func.func @transform_1(%arg0: i32, %arg1: i32) -> (i32, i32) {
    %c1_i32 = arith.constant 1 : i32
    %0 = arith.muli %arg0, %c1_i32 : i32
    %1 = arith.addi %0, %arg1 : i32
    %c0_i32 = arith.constant 0 : i32
    %2 = arith.minsi %1, %c0_i32 : i32
    %c0_i32_0 = arith.constant 0 : i32
    %c0_i32_1 = arith.constant 0 : i32
    return %2, %c0_i32_0 : i32, i32
  }
  func.func @transform_2(%arg0: i32, %arg1: i32) -> (i32, i32) {
    %c1_i32 = arith.constant 1 : i32
    %0 = arith.muli %arg0, %c1_i32 : i32
    %1 = arith.addi %0, %arg1 : i32
    %c0_i32 = arith.constant 0 : i32
    %2 = arith.minsi %1, %c0_i32 : i32
    %c0_i32_0 = arith.constant 0 : i32
    %c0_i32_1 = arith.constant 0 : i32
    return %c0_i32_0, %2 : i32, i32
  }
  func.func @transform_3(%arg0: i32, %arg1: i32) -> (i32, i32) {
    %c0_i32 = arith.constant 0 : i32
    %c0_i32_0 = arith.constant 0 : i32
    return %arg0, %c0_i32 : i32, i32
  }
}

</mosaic_0001>

<bundles_post_ra>
// kernel: tpu_custom_call.1
= control target key start
LH: loop header
LB: loop body
LE: loop exit
PB: predicated region body
PF: predicated region fallthrough
CT: control target
= control target key end

     0   :  { %8 = vsyncpa [#allocation4], 0  ;;  %s1331_s0 = inlined_call_operand.hbm [shape: f32[8,32], index: 0, kind: input, shape index: {}]   ;;  %s1332_s1 = inlined_call_operand.hbm [shape: f32[8,32], index: 1, kind: input, shape index: {}]   ;;  %s1333_s2 = inlined_call_operand.vmem [shape: f32[1,8], index: 2, kind: input, shape index: {}]   ;;  %s1334_s3 = inlined_call_operand.hbm [shape: f32[8,128], index: 3, kind: output, shape index: {}]  }
   0x1   :  { %9 = vsyncpa [#allocation7], 0 }
   0x2   :  { %10 = vsyncpa [#allocation5], 0  ;;  %s1225_s12 = smov [#allocation3]   ;;  %s1226_s14 = smov [#allocation6]  }
   0x3   :  { %s22_s13 = sshll.u32 %s1225_s12, 4  ;;  %s37_s15 = sshll.u32 %s1226_s14, 4  ;;  %s23_s13 = int_to_ptr.vmem [resolvable:$true] %s22_s13  ;;  %s38_s15 = int_to_ptr.vmem [resolvable:$true] %s37_s15 }
   0x4   :  { %s1153_s18 = scalar_lea.hbm %s1331_s0, 128 }
   0x5   :  { %p1154_p0 = scmp.ne.s32.totalorder %s1331_s0, %s1153_s18  ;;  %p1157_p1 = scmp.lt.u32.totalorder %s1153_s18, %s1331_s0 }
   0x7   :  { %p1159_p2 = pnand %p1157_p1, %p1154_p0 }
   0x9   :  { %1162 = shalt.err (!%p1159_p2)
}
   0xa   :  { %s1163_s23 = scalar_lea.vmem %s23_s13, 128  ;;  %p1168_p4 = scmp.lt.s32.totalorder %s23_s13, %s23_s13 }
   0xb   :  { %p1164_p3 = scmp.ne.s32.totalorder %s23_s13, %s1163_s23  ;;  %p1169_p5 = scmp.lt.s32.totalorder %s1163_s23, %s1163_s23 }
   0xd   :  { %p1170_p6 = por %p1169_p5, %p1168_p4 }
   0xf   :  { %p1171_p7 = pnand %p1170_p6, %p1164_p3 }
  0x11   :  { %1174 = shalt.err (!%p1171_p7)
}
  0x12   :  { %25 = dma.hbm_to_vmem [thread:$0]  %s1331_s0, 128, %s23_s13, [#allocation4]  }
  0x13   :  { %s1175_s28 = scalar_lea.hbm %s1332_s1, 128 }
  0x14   :  { %p1176_p8 = scmp.ne.s32.totalorder %s1332_s1, %s1175_s28  ;;  %p1179_p9 = scmp.lt.u32.totalorder %s1175_s28, %s1332_s1 }
  0x16   :  { %p1181_p10 = pnand %p1179_p9, %p1176_p8 }
  0x18   :  { %1184 = shalt.err (!%p1181_p10)
}
  0x19   :  { %s1185_s6 = scalar_lea.vmem %s38_s15, 128  ;;  %p1190_p12 = scmp.lt.s32.totalorder %s38_s15, %s38_s15 }
  0x1a   :  { %p1186_p11 = scmp.ne.s32.totalorder %s38_s15, %s1185_s6  ;;  %p1191_p13 = scmp.lt.s32.totalorder %s1185_s6, %s1185_s6 }
  0x1c   :  { %p1192_p0 = por %p1191_p13, %p1190_p12 }
  0x1e   :  { %p1193_p1 = pnand %p1192_p0, %p1186_p11 }
  0x20   :  { %1196 = shalt.err (!%p1193_p1)
}
  0x21   :  { %40 = dma.hbm_to_vmem [thread:$0]  %s1332_s1, 128, %s38_s15, [#allocation7]  }
  0x22   :  { %1219 = dma.done.wait [#allocation4], 128  }
  0x23   :  { %1220 = vsyncadd [#allocation4], 4294967168 }
  0x24   :  { %1221 = dma.done.wait [#allocation7], 128  }
  0x25   :  { %1222 = vsyncadd [#allocation7], 4294967168  ;;  %v84_v0 = vld [vmem:[#allocation3] sm:$0xff]  ;;  %v85_v1 = vld [vmem:[#allocation6] sm:$0xff]  ;;  %vm89_vm0 = vcmask 261120   ;;  %v1227_v6 = vmov 0.0  }
  0x26   :  { %v86_v2 = vsub.f32 %v84_v0, %v85_v1  ;;  %1093 = vmatprep.subr.mxu0 %v1227_v6  ;;  %1063 = vmatprep.subr.mxu1 %v1227_v6  ;;  %vm1228_vm1 = vmmov 0   ;;  %v103_v7 = vld [vmem:[%s1333_s2] sm:$0x1]  ;;  %vm105_vm2 = vcmask 64512   ;;  %s1229_s2 = smov [#allocation8]  }
  0x27   :  { %1095 = vmatprep.mubr.msk.f32.mxu0 %vm1228_vm1, %v1227_v6  ;;  %1065 = vmatprep.mubr.msk.f32.mxu1 %vm1228_vm1, %v1227_v6  ;;  %v104_v8 = vsub.f32 1.0, %v103_v7  ;;  %v107_v17 = vsel %vm105_vm2, %v103_v7, 0  ;;  %s1022_s9 = sshll.u32 %s1229_s2, 4  ;;  %s1023_s9 = int_to_ptr.vmem [resolvable:$true] %s1022_s9 }
  0x28   :  { %v87_v3 = vadd.f32 1e-06, %v86_v2  ;;  %v175_v20 = vand.u32 4294901760, %v107_v17  ;;  %s1197_s11 = scalar_lea.vmem %s1023_s9, 128  ;;  %p1202_p3 = scmp.lt.s32.totalorder %s1023_s9, %s1023_s9 }
  0x29   :  { %v556_v9 = vsel %vm105_vm2, %v104_v8, 0  ;;  %p1198_p2 = scmp.ne.s32.totalorder %s1023_s9, %s1197_s11  ;;  %p1203_p4 = scmp.lt.s32.totalorder %s1197_s11, %s1197_s11 }
  0x2a   :  { %v88_v4 = vmul.f32 %v87_v3, %v87_v3  ;;  %v1283_v10 = vand.u32 4294901760, %v556_v9  ;;  %v176_v23 = vsub.f32 %v107_v17, %v175_v20 }
  0x2b   :  { %p1204_p5 = por %p1203_p4, %p1202_p3 }
  0x2c   :  { %v90_v5 = vsel %vm89_vm0, %v88_v4, 0.0  ;;  %v625_v11 = vsub.f32 %v556_v9, %v1283_v10  ;;  %v177_v27 = vand.u32 4294901760, %v176_v23 }
  0x2d   :  { %91 = vadd.xlane.f32.xlu0 %v90_v5  ;;  %p1205_p6 = pnand %p1204_p5, %p1198_p2 }
  0x2e   :  { %v626_v12 = vand.u32 4294901760, %v625_v11  ;;  %v178_v31 = vsub.f32 %v176_v23, %v177_v27 }
  0x30   :  { %v627_v13 = vsub.f32 %v625_v11, %v626_v12  ;;  %v179_v34 = vand.u32 4294901760, %v178_v31 }
  0x32   :  { %v628_v15 = vand.u32 4294901760, %v627_v13 }
  0xba   :  { %v92_v14 = vpop.xlane.xlu0 %91 }
  0xbb   :  { %1151 = vrsqrt.f32 %v92_v14  ;;  %v559_v16 = vand.u32 4294901760, %v92_v14  ;;  %vm95_vm3 = vcmp.eq.f32.partialorder %v92_v14, inf  ;;  %v98_v26 = vand.u32 2147483648, %v92_v14 }
  0xbc   :  { %vm97_vm4 = vcmp.eq.f32.partialorder %v92_v14, 0.0 }
  0xbd   :  { %1094 = vmatpush3.msra.mxu0 %v559_v16  ;;  %v636_v18 = vsub.f32 %v92_v14, %v559_v16 }
  0xbe   :  { %1096 = vmatmul.mubr.f32.vlgmr.msra.gmra.mrb[0].mxu0 %v628_v15  ;;  %1098 = vmatprep.subr.mxu0 %v1227_v6 }
  0xbf   :  { %v637_v19 = vand.u32 4294901760, %v636_v18  ;;  %1100 = vmatprep.mubr.msk.f32.mxu0 %vm1228_vm1, %v1227_v6 }
  0xc1   :  { %v638_v21 = vsub.f32 %v636_v18, %v637_v19 }
  0xc3   :  { %v639_v22 = vand.u32 4294901760, %v638_v21 }
  0xc5   :  { %v1152_v24 = vpop.eup %1151  ;;  %1099 = vmatpush3.msra.mxu0 %v639_v22 }
  0xc6   :  { %v94_v25 = vmul.f32 %v1152_v24, %v92_v14  ;;  %1101 = vmatmul.mubr.f32.vlgmr.msra.gmra.mrb[0].mxu0 %v1283_v10  ;;  %1103 = vmatprep.subr.mxu0 %v1227_v6 }
  0xc7   :  { %1104 = vmatpush3.msra.mxu0 %v636_v18  ;;  %1105 = vmatprep.mubr.msk.f32.mxu0 %vm1228_vm1, %v1227_v6 }
  0xc8   :  { %1108 = vmatprep.subr.mxu0 %v1227_v6  ;;  %v96_v28 = vsel %vm95_vm3, %v92_v14, %v94_v25 }
  0xc9   :  { %v99_v29 = vsel %vm97_vm4, %v98_v26, %v96_v28 }
  0xca   :  { %v100_v30 = vsub.f32 2.0, %v99_v29 }
  0xcc   :  { %v101_v32 = vmax.f32 %v100_v30, 0.0 }
  0xce   :  { %1106 = vmatmul.mubr.f32.vlgmr.msra.gmra.mrb[0].mxu0 %v625_v11  ;;  %v102_v33 = vmul.f32 %v101_v32, %v101_v32 }
  0xcf   :  { %1109 = vmatpush3.msra.mxu0 %v559_v16  ;;  %1110 = vmatprep.mubr.msk.f32.mxu0 %vm1228_vm1, %v1227_v6 }
  0xd0   :  { %v110_v35 = vand.u32 4294901760, %v102_v33  ;;  %1113 = vmatprep.subr.mxu0 %v1227_v6 }
  0xd2   :  { %1064 = vmatpush3.msra.mxu1 %v110_v35  ;;  %v187_v36 = vsub.f32 %v102_v33, %v110_v35 }
  0xd3   :  { %1066 = vmatmul.mubr.f32.vlgmr.msra.gmra.mrb[0].mxu1 %v179_v34  ;;  %1068 = vmatprep.subr.mxu1 %v1227_v6 }
  0xd4   :  { %v188_v37 = vand.u32 4294901760, %v187_v36  ;;  %1070 = vmatprep.mubr.msk.f32.mxu1 %vm1228_vm1, %v1227_v6 }
  0xd6   :  { %1111 = vmatmul.mubr.f32.vlgmr.msra.gmra.mrb[0].mxu0 %v626_v12  ;;  %v189_v38 = vsub.f32 %v187_v36, %v188_v37 }
  0xd7   :  { %1114 = vmatpush3.msra.mxu0 %v637_v19  ;;  %1115 = vmatprep.mubr.msk.f32.mxu0 %vm1228_vm1, %v1227_v6 }
  0xd8   :  { %v190_v39 = vand.u32 4294901760, %v189_v38  ;;  %1118 = vmatprep.subr.mxu0 %v1227_v6 }
  0xda   :  { %1069 = vmatpush3.msra.mxu1 %v190_v39 }
  0xdb   :  { %1071 = vmatmul.mubr.f32.vlgmr.msra.gmra.mrb[0].mxu1 %v175_v20  ;;  %1073 = vmatprep.subr.mxu1 %v1227_v6 }
  0xdc   :  { %1074 = vmatpush3.msra.mxu1 %v187_v36  ;;  %1075 = vmatprep.mubr.msk.f32.mxu1 %vm1228_vm1, %v1227_v6 }
  0xdd   :  { %1078 = vmatprep.subr.mxu1 %v1227_v6 }
  0xde   :  { %1116 = vmatmul.mubr.f32.vlgmr.msra.gmra.mrb[0].mxu0 %v1283_v10 }
  0xdf   :  { %1119 = vmatpush3.msra.mxu0 %v559_v16  ;;  %1120 = vmatprep.mubr.msk.f32.mxu0 %vm1228_vm1, %v1227_v6 }
  0xe3   :  { %1076 = vmatmul.mubr.f32.vlgmr.msra.gmra.mrb[0].mxu1 %v176_v23 }
  0xe4   :  { %1079 = vmatpush3.msra.mxu1 %v110_v35  ;;  %1080 = vmatprep.mubr.msk.f32.mxu1 %vm1228_vm1, %v1227_v6 }
  0xe5   :  { %1083 = vmatprep.subr.mxu1 %v1227_v6 }
  0xe6   :  { %1121 = vmatmul.mubr.f32.vlgmr.msra.gmra.mrb[0].mxu0 %v1283_v10 }
  0xeb   :  { %1081 = vmatmul.mubr.f32.vlgmr.msra.gmra.mrb[0].mxu1 %v177_v27 }
  0xec   :  { %1084 = vmatpush3.msra.mxu1 %v188_v37  ;;  %1085 = vmatprep.mubr.msk.f32.mxu1 %vm1228_vm1, %v1227_v6 }
  0xed   :  { %1088 = vmatprep.subr.mxu1 %v1227_v6 }
  0xf3   :  { %1086 = vmatmul.mubr.f32.vlgmr.msra.gmra.mrb[0].mxu1 %v175_v20 }
  0xf4   :  { %1089 = vmatpush3.msra.mxu1 %v110_v35  ;;  %1090 = vmatprep.mubr.msk.f32.mxu1 %vm1228_vm1, %v1227_v6 }
  0xfb   :  { %1091 = vmatmul.mubr.f32.vlgmr.msra.gmra.mrb[0].mxu1 %v175_v20 }
 0x1b9   :  { %v1000_v40 = vpop.f32.mrb[0].mxu0 }
 0x1ba   :  { %v1122_v41 = vpop.f32.mrb[1].mxu0 }
 0x1ce   :  { %v551_v42 = vpop.f32.mrb[0].mxu1 }
 0x1cf   :  { %v1092_v43 = vpop.f32.mrb[1].mxu1  ;;  %v1123_v44 = vadd.f32 %v1000_v40, %v551_v42 }
 0x1d1   :  { %1144 = vpush %v1123_v44 }
 0x202   :  { %s1145_s10 = spop %1144 }
 0x203   :  { %v1007_v45 = vstv %s1145_s10 }
 0x204   :  { %1015 = vst [vmem:[#allocation8] sm:$0xff] %v1007_v45 }
 0x205   :  { %1208 = shalt.err (!%p1205_p6)
}
 0x206   :  { %s1209_s14 = scalar_lea.hbm %s1334_s3, 128 }
 0x207   :  { %p1210_p7 = scmp.ne.s32.totalorder %s1334_s3, %s1209_s14  ;;  %p1213_p8 = scmp.lt.u32.totalorder %s1209_s14, %s1334_s3 }
 0x209   :  { %p1215_p9 = pnand %p1213_p8, %p1210_p7 }
 0x20b   :  { %1218 = shalt.err (!%p1215_p9)
}
 0x20c   :  { %1025 = dma.vmem_to_hbm [thread:$0]  %s1023_s9, 128, %s1334_s3, [#allocation5]  }
 0x20d   :  { %1223 = dma.done.wait [#allocation5], 128  }
 0x20e   :  { %1224 = vsyncadd [#allocation5], 4294967168 }
 0x20f   :  { %1029 = vsyncpa [#allocation4], 1 }
 0x210   :  { %1030 = vsyncpa [#allocation7], 1 }
 0x211   :  { %1031 = vsyncpa [#allocation5], 1 }

</bundles_post_ra>
